<compile_context>
chip_gen: v7x
topology: tpu7x:2x2x1
jax: 0.10.0
libtpu: 0.0.40
codegen_flags: <defaults>
</compile_context>

<pallas_src>
import jax
import jax.numpy as jnp
from jax.experimental import pallas as pl
from jax.experimental.pallas import tpu as pltpu

EPS = 1e-5


def _conv3x3_banded(x2d, s_ref, bw_ref):
    """3x3 SAME conv in the (NH, WC) layout via shift + banded-weight matmuls."""
    acc = None
    for dy in range(3):
        if dy == 1:
            xs = x2d                                   # S_1 is the identity
        else:
            xs = jnp.dot(s_ref[dy], x2d, preferred_element_type=jnp.float32)
        tap = jnp.dot(xs, bw_ref[dy], preferred_element_type=jnp.float32)
        acc = tap if acc is None else acc + tap
    return acc


def _bn_relu(y, a_ref, gamma, beta):
    """Training-mode BN (single-pass stats, folded scale/offset) + ReLU.

    a_ref already carries the 1/(N*H*W) normalisation, so a single matmul
    against it turns the per-(w,c) column sums / sumsq into the per-channel
    mean / E[x^2], tiled across all W lane-groups.
    """
    col_s = jnp.sum(y, axis=0, keepdims=True)          # (1, WC) per-(w,c) sum
    col_q = jnp.sum(y * y, axis=0, keepdims=True)      # (1, WC) per-(w,c) sumsq
    stats = jnp.concatenate([col_s, col_q], axis=0)    # (2, WC)
    agg = jnp.dot(stats, a_ref[...], preferred_element_type=jnp.float32)
    mu, ex2 = agg[0:1, :], agg[1:2, :]                 # per-channel, tiled
    var = ex2 - mu * mu
    scale = gamma * jax.lax.rsqrt(var + EPS)            # (1, WC) folded BN scale
    offset = beta - mu * scale                          # (1, WC) folded BN offset
    return jnp.maximum(y * scale + offset, 0.0)


def residual_block_kernel(x_ref, s_ref, bw1_ref, bw2_ref, a_ref,
                          g1_ref, be1_ref, g2_ref, be2_ref, out_ref):
    """Whole residual block, all operands VMEM-resident, lane-dense layout.

    x_ref   : (NH, WC)        activations, rows = n*H + h, cols = w*C + c
    s_ref   : (3, NH, NH)     vertical shift (+ zero-pad boundary) matrices
    bw*_ref : (3, WC, WC)     block-banded conv weights (horizontal taps folded)
    a_ref   : (WC, WC)        channel-aggregation matrix (1/count folded in)
    g*/be*  : (1, WC)         BN gamma / beta pre-tiled across the W groups
    out_ref : (NH, WC)
    """
    x = x_ref[...].astype(jnp.float32)

    h1 = _bn_relu(_conv3x3_banded(x, s_ref, bw1_ref), a_ref,
                  g1_ref[...], be1_ref[...])
    h2 = _bn_relu(_conv3x3_banded(h1, s_ref, bw2_ref), a_ref,
                  g2_ref[...], be2_ref[...])

    out_ref[...] = jnp.maximum(h2 + x, 0.0).astype(out_ref.dtype)


@jax.jit
def residual_block_forward(x_nchw, params):
    """x_nchw: (N, C, H, W) float32. Returns (N, C, H, W)."""
    w1, b1, g1, be1, w2, b2, g2, be2 = params
    del b1, b2   # cancelled exactly by the training-mode BN mean subtraction
    N, C, H, W = x_nchw.shape
    NH, WC = N * H, W * C

    # NHWC, then lane-dense 2-D layout (rows = n*H + h, cols = w*C + c).
    x2d = jnp.transpose(x_nchw, (0, 2, 3, 1)).reshape(NH, WC)

    # Vertical shift matrices for dy in {0,1,2}; block-diagonal over images so
    # top/bottom zero padding and batch boundaries are handled by the matmul.
    s_mats = jnp.stack([jnp.kron(jnp.eye(N, dtype=jnp.float32),
                                 jnp.eye(H, k=dy - 1, dtype=jnp.float32))
                        for dy in range(3)])                       # (3, NH, NH)

    def banded(w):   # w: (3, 3, Cin, Cout) HWIO -> (3, W*Cin, W*Cout)
        rows = []
        for dy in range(3):
            b = sum(jnp.kron(jnp.eye(W, k=1 - dx, dtype=w.dtype), w[dy, dx])
                    for dx in range(3))
            rows.append(b)
        return jnp.stack(rows)

    bw1, bw2 = banded(w1), banded(w2)

    # Channel aggregation with the BN normalisation folded in:
    # (v @ A)[w*C + c] = (1/(N*H*W)) * sum_{w'} v[w'*C + c].
    a_mat = jnp.kron(jnp.ones((W, W), jnp.float32),
                     jnp.eye(C, dtype=jnp.float32)) * (1.0 / float(N * H * W))

    tile_c = lambda v: jnp.tile(v.reshape(1, C), (1, W))           # (1, WC)

    out2d = pl.pallas_call(
        residual_block_kernel,
        out_shape=jax.ShapeDtypeStruct((NH, WC), x_nchw.dtype),
        in_specs=[pl.BlockSpec(memory_space=pltpu.MemorySpace.VMEM)] * 9,
        out_specs=pl.BlockSpec(memory_space=pltpu.MemorySpace.VMEM),
    )(x2d, s_mats, bw1, bw2, a_mat,
      tile_c(g1), tile_c(be1), tile_c(g2), tile_c(be2))

    return jnp.transpose(out2d.reshape(N, H, W, C), (0, 3, 1, 2))  # back to NCHW


def reference_forward(x_nchw, params):
    """Pure-JAX reference mirroring the PyTorch forward (training-mode BN)."""
    w1, b1, g1, be1, w2, b2, g2, be2 = params

    def conv(x, w, b):  # x NHWC, w HWIO
        y = jax.lax.conv_general_dilated(
            x, w, window_strides=(1, 1), padding='SAME',
            dimension_numbers=('NHWC', 'HWIO', 'NHWC'))
        return y + b

    def bn_relu(y, g, be):
        mu = jnp.mean(y, axis=(0, 1, 2), keepdims=True)
        var = jnp.mean((y - mu) ** 2, axis=(0, 1, 2), keepdims=True)
        return jnp.maximum((y - mu) * jax.lax.rsqrt(var + EPS) * g + be, 0.0)

    x = jnp.transpose(x_nchw, (0, 2, 3, 1))
    h = bn_relu(conv(x, w1, b1), g1, be1)
    h = bn_relu(conv(h, w2, b2), g2, be2)
    return jnp.transpose(jnp.maximum(h + x, 0.0), (0, 3, 1, 2))


def init_params(key, c_in, c_out):
    ks = jax.random.split(key, 8)
    w1 = 0.1 * jax.random.normal(ks[0], (3, 3, c_in, c_out), jnp.float32)
    b1 = 0.05 * jax.random.normal(ks[1], (1, c_out), jnp.float32)
    g1 = 1.0 + 0.1 * jax.random.normal(ks[2], (1, c_out), jnp.float32)
    be1 = 0.1 * jax.random.normal(ks[3], (1, c_out), jnp.float32)
    w2 = 0.1 * jax.random.normal(ks[4], (3, 3, c_out, c_out), jnp.float32)
    b2 = 0.05 * jax.random.normal(ks[5], (1, c_out), jnp.float32)
    g2 = 1.0 + 0.1 * jax.random.normal(ks[6], (1, c_out), jnp.float32)
    be2 = 0.1 * jax.random.normal(ks[7], (1, c_out), jnp.float32)
    return (w1, b1, g1, be1, w2, b2, g2, be2)


if __name__ == "__main__":
    # same_shape=True residual block requires in_channel == out_channel.
    # C=8, W=16 makes the kernel's lane dim W*C = 128 (fully lane-dense).
    N, C, H, W = 2, 8, 16, 16
    key = jax.random.PRNGKey(0)
    k_x, k_p = jax.random.split(key)
    x = jax.random.normal(k_x, (N, C, H, W), jnp.float32)
    params = init_params(k_p, C, C)

    out = jax.block_until_ready(residual_block_forward(x, params))
    ref = reference_forward(x, params)

    assert out.shape == (N, C, H, W)
    err = float(jnp.max(jnp.abs(out - ref)))
    assert jnp.allclose(out, ref, atol=1e-3, rtol=1e-3), err

    print("KERNEL_OK")
</pallas_src>

<mosaic_0001>
module attributes {stable_mosaic.version = 11 : i64} {
  func.func @residual_block_kernel(%arg0: memref<32x128xf32, #tpu.memory_space<vmem>>, %arg1: memref<3x32x32xf32, #tpu.memory_space<vmem>>, %arg2: memref<3x128x128xf32, #tpu.memory_space<vmem>>, %arg3: memref<3x128x128xf32, #tpu.memory_space<vmem>>, %arg4: memref<128x128xf32, #tpu.memory_space<vmem>>, %arg5: memref<1x128xf32, #tpu.memory_space<vmem>>, %arg6: memref<1x128xf32, #tpu.memory_space<vmem>>, %arg7: memref<1x128xf32, #tpu.memory_space<vmem>>, %arg8: memref<1x128xf32, #tpu.memory_space<vmem>>, %arg9: memref<32x128xf32, #tpu.memory_space<vmem>>) attributes {dimension_semantics = [], scalar_prefetch = 0 : i64, scratch_operands = 0 : i64, tpu.core_type = #tpu.core_type<tc>} {
    %c0 = arith.constant 0 : index
    %c0_0 = arith.constant 0 : index
    %0 = vector.load %arg0[%c0, %c0_0] : memref<32x128xf32, #tpu.memory_space<vmem>>, vector<32x128xf32>
    %c0_1 = arith.constant 0 : index
    %c0_2 = arith.constant 0 : index
    %c0_3 = arith.constant 0 : index
    %1 = vector.load %arg1[%c0_1, %c0_2, %c0_3] : memref<3x32x32xf32, #tpu.memory_space<vmem>>, vector<1x32x32xf32>
    %2 = vector.shape_cast %1 : vector<1x32x32xf32> to vector<32x32xf32>
    %cst = arith.constant dense<0.000000e+00> : vector<32x128xf32>
    %3 = tpu.matmul %2, %0, %cst {dimension_numbers = #tpu.dot_dimension_numbers<[1], [0], [0], [1], [0, 0, 1, 1], [], []>} : vector<32x32xf32>, vector<32x128xf32>, vector<32x128xf32> -> vector<32x128xf32>
    %c0_4 = arith.constant 0 : index
    %c0_5 = arith.constant 0 : index
    %c0_6 = arith.constant 0 : index
    %4 = vector.load %arg2[%c0_4, %c0_5, %c0_6] : memref<3x128x128xf32, #tpu.memory_space<vmem>>, vector<1x128x128xf32>
    %5 = vector.shape_cast %4 : vector<1x128x128xf32> to vector<128x128xf32>
    %cst_7 = arith.constant dense<0.000000e+00> : vector<32x128xf32>
    %6 = tpu.matmul %3, %5, %cst_7 {dimension_numbers = #tpu.dot_dimension_numbers<[1], [0], [0], [1], [0, 0, 1, 1], [], []>} : vector<32x128xf32>, vector<128x128xf32>, vector<32x128xf32> -> vector<32x128xf32>
    %c1 = arith.constant 1 : index
    %c0_8 = arith.constant 0 : index
    %c0_9 = arith.constant 0 : index
    %7 = vector.load %arg2[%c1, %c0_8, %c0_9] : memref<3x128x128xf32, #tpu.memory_space<vmem>>, vector<1x128x128xf32>
    %8 = vector.shape_cast %7 : vector<1x128x128xf32> to vector<128x128xf32>
    %cst_10 = arith.constant dense<0.000000e+00> : vector<32x128xf32>
    %9 = tpu.matmul %0, %8, %cst_10 {dimension_numbers = #tpu.dot_dimension_numbers<[1], [0], [0], [1], [0, 0, 1, 1], [], []>} : vector<32x128xf32>, vector<128x128xf32>, vector<32x128xf32> -> vector<32x128xf32>
    %10 = arith.addf %6, %9 : vector<32x128xf32>
    %c2 = arith.constant 2 : index
    %c0_11 = arith.constant 0 : index
    %c0_12 = arith.constant 0 : index
    %11 = vector.load %arg1[%c2, %c0_11, %c0_12] : memref<3x32x32xf32, #tpu.memory_space<vmem>>, vector<1x32x32xf32>
    %12 = vector.shape_cast %11 : vector<1x32x32xf32> to vector<32x32xf32>
    %cst_13 = arith.constant dense<0.000000e+00> : vector<32x128xf32>
    %13 = tpu.matmul %12, %0, %cst_13 {dimension_numbers = #tpu.dot_dimension_numbers<[1], [0], [0], [1], [0, 0, 1, 1], [], []>} : vector<32x32xf32>, vector<32x128xf32>, vector<32x128xf32> -> vector<32x128xf32>
    %c2_14 = arith.constant 2 : index
    %c0_15 = arith.constant 0 : index
    %c0_16 = arith.constant 0 : index
    %14 = vector.load %arg2[%c2_14, %c0_15, %c0_16] : memref<3x128x128xf32, #tpu.memory_space<vmem>>, vector<1x128x128xf32>
    %15 = vector.shape_cast %14 : vector<1x128x128xf32> to vector<128x128xf32>
    %cst_17 = arith.constant dense<0.000000e+00> : vector<32x128xf32>
    %16 = tpu.matmul %13, %15, %cst_17 {dimension_numbers = #tpu.dot_dimension_numbers<[1], [0], [0], [1], [0, 0, 1, 1], [], []>} : vector<32x128xf32>, vector<128x128xf32>, vector<32x128xf32> -> vector<32x128xf32>
    %17 = arith.addf %10, %16 : vector<32x128xf32>
    %c0_18 = arith.constant 0 : index
    %c0_19 = arith.constant 0 : index
    %18 = vector.load %arg5[%c0_18, %c0_19] : memref<1x128xf32, #tpu.memory_space<vmem>>, vector<1x128xf32>
    %c0_20 = arith.constant 0 : index
    %c0_21 = arith.constant 0 : index
    %19 = vector.load %arg6[%c0_20, %c0_21] : memref<1x128xf32, #tpu.memory_space<vmem>>, vector<1x128xf32>
    %cst_22 = arith.constant dense<0.000000e+00> : vector<128xf32>
    %20 = vector.multi_reduction <add>, %17, %cst_22 [0] : vector<32x128xf32> to vector<128xf32>
    %21 = vector.shape_cast %20 : vector<128xf32> to vector<1x128xf32>
    %22 = arith.mulf %17, %17 : vector<32x128xf32>
    %cst_23 = arith.constant dense<0.000000e+00> : vector<128xf32>
    %23 = vector.multi_reduction <add>, %22, %cst_23 [0] : vector<32x128xf32> to vector<128xf32>
    %24 = vector.shape_cast %23 : vector<128xf32> to vector<1x128xf32>
    %25 = tpu.concatenate %21, %24 in 0 : vector<1x128xf32>, vector<1x128xf32> -> vector<2x128xf32>
    %c0_24 = arith.constant 0 : index
    %c0_25 = arith.constant 0 : index
    %26 = vector.load %arg4[%c0_24, %c0_25] : memref<128x128xf32, #tpu.memory_space<vmem>>, vector<128x128xf32>
    %cst_26 = arith.constant dense<0.000000e+00> : vector<2x128xf32>
    %27 = tpu.matmul %25, %26, %cst_26 {dimension_numbers = #tpu.dot_dimension_numbers<[1], [0], [0], [1], [0, 0, 1, 1], [], []>} : vector<2x128xf32>, vector<128x128xf32>, vector<2x128xf32> -> vector<2x128xf32>
    %28 = vector.extract_strided_slice %27 {offsets = [0, 0], sizes = [1, 128], strides = [1, 1]} : vector<2x128xf32> to vector<1x128xf32>
    %29 = vector.extract_strided_slice %27 {offsets = [1, 0], sizes = [1, 128], strides = [1, 1]} : vector<2x128xf32> to vector<1x128xf32>
    %30 = arith.mulf %28, %28 : vector<1x128xf32>
    %31 = arith.subf %29, %30 : vector<1x128xf32>
    %cst_27 = arith.constant 9.99999974E-6 : f32
    %32 = vector.broadcast %cst_27 : f32 to vector<1x128xf32>
    %33 = arith.addf %31, %32 : vector<1x128xf32>
    %34 = math.rsqrt %33 : vector<1x128xf32>
    %35 = arith.mulf %18, %34 : vector<1x128xf32>
    %36 = arith.mulf %28, %35 : vector<1x128xf32>
    %37 = arith.subf %19, %36 : vector<1x128xf32>
    %38 = vector.broadcast %35 : vector<1x128xf32> to vector<32x128xf32>
    %39 = arith.mulf %17, %38 : vector<32x128xf32>
    %40 = vector.broadcast %37 : vector<1x128xf32> to vector<32x128xf32>
    %41 = arith.addf %39, %40 : vector<32x128xf32>
    %cst_28 = arith.constant 0.000000e+00 : f32
    %42 = vector.broadcast %cst_28 : f32 to vector<32x128xf32>
    %43 = arith.maximumf %41, %42 : vector<32x128xf32>
    %c0_29 = arith.constant 0 : index
    %c0_30 = arith.constant 0 : index
    %c0_31 = arith.constant 0 : index
    %44 = vector.load %arg1[%c0_29, %c0_30, %c0_31] : memref<3x32x32xf32, #tpu.memory_space<vmem>>, vector<1x32x32xf32>
    %45 = vector.shape_cast %44 : vector<1x32x32xf32> to vector<32x32xf32>
    %cst_32 = arith.constant dense<0.000000e+00> : vector<32x128xf32>
    %46 = tpu.matmul %45, %43, %cst_32 {dimension_numbers = #tpu.dot_dimension_numbers<[1], [0], [0], [1], [0, 0, 1, 1], [], []>} : vector<32x32xf32>, vector<32x128xf32>, vector<32x128xf32> -> vector<32x128xf32>
    %c0_33 = arith.constant 0 : index
    %c0_34 = arith.constant 0 : index
    %c0_35 = arith.constant 0 : index
    %47 = vector.load %arg3[%c0_33, %c0_34, %c0_35] : memref<3x128x128xf32, #tpu.memory_space<vmem>>, vector<1x128x128xf32>
    %48 = vector.shape_cast %47 : vector<1x128x128xf32> to vector<128x128xf32>
    %cst_36 = arith.constant dense<0.000000e+00> : vector<32x128xf32>
    %49 = tpu.matmul %46, %48, %cst_36 {dimension_numbers = #tpu.dot_dimension_numbers<[1], [0], [0], [1], [0, 0, 1, 1], [], []>} : vector<32x128xf32>, vector<128x128xf32>, vector<32x128xf32> -> vector<32x128xf32>
    %c1_37 = arith.constant 1 : index
    %c0_38 = arith.constant 0 : index
    %c0_39 = arith.constant 0 : index
    %50 = vector.load %arg3[%c1_37, %c0_38, %c0_39] : memref<3x128x128xf32, #tpu.memory_space<vmem>>, vector<1x128x128xf32>
    %51 = vector.shape_cast %50 : vector<1x128x128xf32> to vector<128x128xf32>
    %cst_40 = arith.constant dense<0.000000e+00> : vector<32x128xf32>
    %52 = tpu.matmul %43, %51, %cst_40 {dimension_numbers = #tpu.dot_dimension_numbers<[1], [0], [0], [1], [0, 0, 1, 1], [], []>} : vector<32x128xf32>, vector<128x128xf32>, vector<32x128xf32> -> vector<32x128xf32>
    %53 = arith.addf %49, %52 : vector<32x128xf32>
    %c2_41 = arith.constant 2 : index
    %c0_42 = arith.constant 0 : index
    %c0_43 = arith.constant 0 : index
    %54 = vector.load %arg1[%c2_41, %c0_42, %c0_43] : memref<3x32x32xf32, #tpu.memory_space<vmem>>, vector<1x32x32xf32>
    %55 = vector.shape_cast %54 : vector<1x32x32xf32> to vector<32x32xf32>
    %cst_44 = arith.constant dense<0.000000e+00> : vector<32x128xf32>
    %56 = tpu.matmul %55, %43, %cst_44 {dimension_numbers = #tpu.dot_dimension_numbers<[1], [0], [0], [1], [0, 0, 1, 1], [], []>} : vector<32x32xf32>, vector<32x128xf32>, vector<32x128xf32> -> vector<32x128xf32>
    %c2_45 = arith.constant 2 : index
    %c0_46 = arith.constant 0 : index
    %c0_47 = arith.constant 0 : index
    %57 = vector.load %arg3[%c2_45, %c0_46, %c0_47] : memref<3x128x128xf32, #tpu.memory_space<vmem>>, vector<1x128x128xf32>
    %58 = vector.shape_cast %57 : vector<1x128x128xf32> to vector<128x128xf32>
    %cst_48 = arith.constant dense<0.000000e+00> : vector<32x128xf32>
    %59 = tpu.matmul %56, %58, %cst_48 {dimension_numbers = #tpu.dot_dimension_numbers<[1], [0], [0], [1], [0, 0, 1, 1], [], []>} : vector<32x128xf32>, vector<128x128xf32>, vector<32x128xf32> -> vector<32x128xf32>
    %60 = arith.addf %53, %59 : vector<32x128xf32>
    %c0_49 = arith.constant 0 : index
    %c0_50 = arith.constant 0 : index
    %61 = vector.load %arg7[%c0_49, %c0_50] : memref<1x128xf32, #tpu.memory_space<vmem>>, vector<1x128xf32>
    %c0_51 = arith.constant 0 : index
    %c0_52 = arith.constant 0 : index
    %62 = vector.load %arg8[%c0_51, %c0_52] : memref<1x128xf32, #tpu.memory_space<vmem>>, vector<1x128xf32>
    %cst_53 = arith.constant dense<0.000000e+00> : vector<128xf32>
    %63 = vector.multi_reduction <add>, %60, %cst_53 [0] : vector<32x128xf32> to vector<128xf32>
    %64 = vector.shape_cast %63 : vector<128xf32> to vector<1x128xf32>
    %65 = arith.mulf %60, %60 : vector<32x128xf32>
    %cst_54 = arith.constant dense<0.000000e+00> : vector<128xf32>
    %66 = vector.multi_reduction <add>, %65, %cst_54 [0] : vector<32x128xf32> to vector<128xf32>
    %67 = vector.shape_cast %66 : vector<128xf32> to vector<1x128xf32>
    %68 = tpu.concatenate %64, %67 in 0 : vector<1x128xf32>, vector<1x128xf32> -> vector<2x128xf32>
    %c0_55 = arith.constant 0 : index
    %c0_56 = arith.constant 0 : index
    %69 = vector.load %arg4[%c0_55, %c0_56] : memref<128x128xf32, #tpu.memory_space<vmem>>, vector<128x128xf32>
    %cst_57 = arith.constant dense<0.000000e+00> : vector<2x128xf32>
    %70 = tpu.matmul %68, %69, %cst_57 {dimension_numbers = #tpu.dot_dimension_numbers<[1], [0], [0], [1], [0, 0, 1, 1], [], []>} : vector<2x128xf32>, vector<128x128xf32>, vector<2x128xf32> -> vector<2x128xf32>
    %71 = vector.extract_strided_slice %70 {offsets = [0, 0], sizes = [1, 128], strides = [1, 1]} : vector<2x128xf32> to vector<1x128xf32>
    %72 = vector.extract_strided_slice %70 {offsets = [1, 0], sizes = [1, 128], strides = [1, 1]} : vector<2x128xf32> to vector<1x128xf32>
    %73 = arith.mulf %71, %71 : vector<1x128xf32>
    %74 = arith.subf %72, %73 : vector<1x128xf32>
    %cst_58 = arith.constant 9.99999974E-6 : f32
    %75 = vector.broadcast %cst_58 : f32 to vector<1x128xf32>
    %76 = arith.addf %74, %75 : vector<1x128xf32>
    %77 = math.rsqrt %76 : vector<1x128xf32>
    %78 = arith.mulf %61, %77 : vector<1x128xf32>
    %79 = arith.mulf %71, %78 : vector<1x128xf32>
    %80 = arith.subf %62, %79 : vector<1x128xf32>
    %81 = vector.broadcast %78 : vector<1x128xf32> to vector<32x128xf32>
    %82 = arith.mulf %60, %81 : vector<32x128xf32>
    %83 = vector.broadcast %80 : vector<1x128xf32> to vector<32x128xf32>
    %84 = arith.addf %82, %83 : vector<32x128xf32>
    %cst_59 = arith.constant 0.000000e+00 : f32
    %85 = vector.broadcast %cst_59 : f32 to vector<32x128xf32>
    %86 = arith.maximumf %84, %85 : vector<32x128xf32>
    %87 = arith.addf %86, %0 : vector<32x128xf32>
    %cst_60 = arith.constant 0.000000e+00 : f32
    %88 = vector.broadcast %cst_60 : f32 to vector<32x128xf32>
    %89 = arith.maximumf %87, %88 : vector<32x128xf32>
    %c0_61 = arith.constant 0 : index
    %c0_62 = arith.constant 0 : index
    %90 = vector.load %arg9[%c0_61, %c0_62] : memref<32x128xf32, #tpu.memory_space<vmem>>, vector<32x128xf32>
    tpu.vector_store %arg9[%c0_61, %c0_62], %89 {strides = array<i32>} : memref<32x128xf32, #tpu.memory_space<vmem>>, vector<32x128xf32>,
    return
  }
}

</mosaic_0001>

<bundles_post_ra>
// kernel: residual_block_forward.1
= control target key start
LH: loop header
LB: loop body
LE: loop exit
PB: predicated region body
PF: predicated region fallthrough
CT: control target
= control target key end

     0   :  { %vm40_vm0 = vcmask 261120   ;;  %vm2278_vm1 = vmmov 0   ;;  %vm573_vm2 = vcmask 1040384   ;;  %s2886_s0 = inlined_call_operand.vmem [shape: f32[32,128], index: 0, kind: input, shape index: {}]   ;;  %s2887_s1 = inlined_call_operand.vmem [shape: f32[3,32,32], index: 1, kind: input, shape index: {}]   ;;  %s2888_s2 = inlined_call_operand.vmem [shape: f32[3,128,128], index: 2, kind: input, shape index: {}]   ;;  %s2889_s4 = inlined_call_operand.vmem [shape: f32[128,128], index: 4, kind: input, shape index: {}]   ;;  %s2890_s5 = inlined_call_operand.vmem [shape: f32[1,128], index: 5, kind: input, shape index: {}]   ;;  %s2891_s6 = inlined_call_operand.vmem [shape: f32[1,128], index: 6, kind: input, shape index: {}]   ;;  %s2892_s3 = inlined_call_operand.vmem [shape: f32[3,128,128], index: 3, kind: input, shape index: {}]   ;;  %s2893_s7 = inlined_call_operand.vmem [shape: f32[1,128], index: 7, kind: input, shape index: {}]   ;;  %s2894_s8 = inlined_call_operand.vmem [shape: f32[1,128], index: 8, kind: input, shape index: {}]   ;;  %s2895_s9 = inlined_call_operand.vmem [shape: f32[32,128], index: 9, kind: output, shape index: {}]  }
   0x1   :  { %v32_v0 = vld [vmem:[%s2886_s0] sm:$0xff]  ;;  %v2337_v1 = vld [vmem:[%s2886_s0 + $0x8] sm:$0xff]  ;;  %v2342_v2 = vld [vmem:[%s2886_s0 + $0x10] sm:$0xff] }
   0x2   :  { %v1977_v3 = vpack.c.bf16 %v2337_v1, %v32_v0  ;;  %v2348_v4 = vld [vmem:[%s2886_s0 + $0x18] sm:$0xff]  ;;  %v2353_v5 = vld [vmem:[%s2887_s1] sm:$0xff]  ;;  %v1358_v9 = vld [vmem:[%s2888_s2 + $0x88] sm:$0xff] }
   0x3   :  { %v1981_v6 = vpack.c.bf16 %v2348_v4, %v2342_v2  ;;  %1631 = vmatprep.mubr.msk.f32.mxu1 %vm40_vm0, %v2353_v5  ;;  %v2362_v7 = vld [vmem:[%s2887_s1 + $0x40] sm:$0xff]  ;;  %v1359_v11 = vld [vmem:[%s2888_s2 + $0x90] sm:$0xff]  ;;  %v1360_v12 = vld [vmem:[%s2888_s2 + $0x98] sm:$0xff] }
   0x4   :  { %1978 = vmatprep.subr.bf16.mxu1 %v1977_v3  ;;  %2050 = vmatprep.subr.bf16.mxu0 %v1977_v3  ;;  %v1357_v8 = vld [vmem:[%s2888_s2 + $0x80] sm:$0xff]  ;;  %v2381_v13 = vld [vmem:[%s2887_s1 + $0x8] sm:$0xff]  ;;  %v2391_v15 = vld [vmem:[%s2887_s1 + $0x10] sm:$0xff]  ;;  %v1989_v17 = vpack.c.bf16 %v1360_v12, %v1359_v11 }
   0x5   :  { %1980 = vmatpush3.bf16.msra.mxu1 %v1977_v3  ;;  %2052 = vmatpush3.bf16.msra.mxu0 %v1977_v3  ;;  %v1985_v10 = vpack.c.bf16 %v1358_v9, %v1357_v8  ;;  %v2386_v14 = vld [vmem:[%s2887_s1 + $0x48] sm:$0xff]  ;;  %v2396_v16 = vld [vmem:[%s2887_s1 + $0x50] sm:$0xff]  ;;  %v1361_v18 = vld [vmem:[%s2888_s2 + $0xa0] sm:$0xff] }
   0x6   :  { %1982 = vmatprep.subr.bf16.mxu1 %v1981_v6  ;;  %2054 = vmatprep.subr.bf16.mxu0 %v1981_v6  ;;  %v1362_v19 = vld [vmem:[%s2888_s2 + $0xa8] sm:$0xff]  ;;  %v2413_v20 = vld [vmem:[%s2887_s1 + $0x18] sm:$0xff]  ;;  %v1363_v23 = vld [vmem:[%s2888_s2 + $0xb0] sm:$0xff] }
   0x7   :  { %1721 = vmatprep.mubr.msk.f32.mxu0 %vm40_vm0, %v2362_v7  ;;  %v2420_v21 = vld [vmem:[%s2887_s1 + $0x58] sm:$0xff]  ;;  %v1993_v22 = vpack.c.bf16 %v1362_v19, %v1361_v18  ;;  %v1365_v26 = vld [vmem:[%s2888_s2 + $0xc0] sm:$0xff]  ;;  %v1366_v27 = vld [vmem:[%s2888_s2 + $0xc8] sm:$0xff] }
   0x8   :  { %v1364_v24 = vld [vmem:[%s2888_s2 + $0xb8] sm:$0xff]  ;;  %v2001_v28 = vpack.c.bf16 %v1366_v27, %v1365_v26  ;;  %v1367_v29 = vld [vmem:[%s2888_s2 + $0xd0] sm:$0xff]  ;;  %v1369_v32 = vld [vmem:[%s2888_s2 + $0xe0] sm:$0xff] }
   0x9   :  { %1984 = vmatpush3.bf16.msra.mxu1 %v1981_v6  ;;  %2056 = vmatpush3.bf16.msra.mxu0 %v1981_v6  ;;  %v1997_v25 = vpack.c.bf16 %v1364_v24, %v1363_v23  ;;  %v1368_v30 = vld [vmem:[%s2888_s2 + $0xd8] sm:$0xff]  ;;  %v1370_v33 = vld [vmem:[%s2888_s2 + $0xe8] sm:$0xff]  ;;  %v1371_v35 = vld [vmem:[%s2888_s2 + $0xf0] sm:$0xff] }
   0xa   :  { %1986 = vmatprep.subr.bf16.mxu1 %v1985_v10  ;;  %v2005_v31 = vpack.c.bf16 %v1368_v30, %v1367_v29  ;;  %v2009_v34 = vpack.c.bf16 %v1370_v33, %v1369_v32  ;;  %v1372_v36 = vld [vmem:[%s2888_s2 + $0xf8] sm:$0xff]  ;;  %v138_v38 = vld [vmem:[%s2888_s2] sm:$0xff]  ;;  %v139_v39 = vld [vmem:[%s2888_s2 + $0x8] sm:$0xff] }
   0xb   :  { %v2013_v37 = vpack.c.bf16 %v1372_v36, %v1371_v35  ;;  %v2017_v40 = vpack.c.bf16 %v139_v39, %v138_v38  ;;  %v140_v41 = vld [vmem:[%s2888_s2 + $0x10] sm:$0xff]  ;;  %v141_v42 = vld [vmem:[%s2888_s2 + $0x18] sm:$0xff]  ;;  %v142_v44 = vld [vmem:[%s2888_s2 + $0x20] sm:$0xff] }
   0xc   :  { %1632 = vmatmul.mubr.msk.f32.vlgmr.msra.gmra.mrb[0].mxu1 %vm40_vm0, %v2381_v13  ;;  %1722 = vmatmul.mubr.msk.f32.vlgmr.msra.gmra.mrb[0].mxu0 %vm40_vm0, %v2386_v14  ;;  %v2021_v43 = vpack.c.bf16 %v141_v42, %v140_v41  ;;  %v143_v45 = vld [vmem:[%s2888_s2 + $0x28] sm:$0xff]  ;;  %v144_v47 = vld [vmem:[%s2888_s2 + $0x30] sm:$0xff]  ;;  %v145_v48 = vld [vmem:[%s2888_s2 + $0x38] sm:$0xff] }
   0xd   :  { %1634 = vmatprep.mubr.msk.f32.mxu1 %vm40_vm0, %v2391_v15  ;;  %1724 = vmatprep.mubr.msk.f32.mxu0 %vm40_vm0, %v2396_v16  ;;  %v2025_v46 = vpack.c.bf16 %v143_v45, %v142_v44  ;;  %v2029_v49 = vpack.c.bf16 %v145_v48, %v144_v47  ;;  %v146_v50 = vld [vmem:[%s2888_s2 + $0x40] sm:$0xff]  ;;  %v147_v51 = vld [vmem:[%s2888_s2 + $0x48] sm:$0xff]  ;;  %v148_v53 = vld [vmem:[%s2888_s2 + $0x50] sm:$0xff] }
   0xe   :  { %1988 = vmatpush3.bf16.msra.mxu1 %v1985_v10  ;;  %v2033_v52 = vpack.c.bf16 %v147_v51, %v146_v50  ;;  %v149_v54 = vld [vmem:[%s2888_s2 + $0x58] sm:$0xff]  ;;  %v150_v56 = vld [vmem:[%s2888_s2 + $0x60] sm:$0xff]  ;;  %v151_v57 = vld [vmem:[%s2888_s2 + $0x68] sm:$0xff] }
   0xf   :  { %1990 = vmatprep.subr.bf16.mxu1 %v1989_v17  ;;  %v2037_v55 = vpack.c.bf16 %v149_v54, %v148_v53  ;;  %v2041_v58 = vpack.c.bf16 %v151_v57, %v150_v56  ;;  %v152_v59 = vld [vmem:[%s2888_s2 + $0x70] sm:$0xff]  ;;  %v153_v60 = vld [vmem:[%s2888_s2 + $0x78] sm:$0xff]  ;;  %v1381_v62 = vld [vmem:[%s2888_s2 + $0x100] sm:$0xff] }
  0x10   :  { %1635 = vmatmul.mubr.msk.f32.gmra.mrb[2].mxu1 %vm40_vm0, %v2413_v20  ;;  %1725 = vmatmul.mubr.msk.f32.gmra.mrb[2].mxu0 %vm40_vm0, %v2420_v21  ;;  %v2045_v61 = vpack.c.bf16 %v153_v60, %v152_v59  ;;  %v1382_v63 = vld [vmem:[%s2888_s2 + $0x108] sm:$0xff]  ;;  %v578_v8 = vld [vmem:[%s2889_s4 + $0x18] sm:$0xff]  ;;  %v1383_v10 = vld [vmem:[%s2888_s2 + $0x110] sm:$0xff] }
  0x11   :  { %1669 = vmatprep.mubr.f32.mxu1 %v32_v0  ;;  %v2057_v0 = vpack.c.bf16 %v1382_v63, %v1381_v62  ;;  %v576_v3 = vld [vmem:[%s2889_s4 + $0x8] sm:$0xff]  ;;  %v1384_v11 = vld [vmem:[%s2888_s2 + $0x118] sm:$0xff]  ;;  %v1385_v23 = vld [vmem:[%s2888_s2 + $0x120] sm:$0xff]  ;;  %v2279_v62 = vmov 0.0  }
  0x12   :  { %1992 = vmatpush3.bf16.msra.mxu1 %v1989_v17  ;;  %v2061_v19 = vpack.c.bf16 %v1384_v11, %v1383_v10  ;;  %v1386_v24 = vld [vmem:[%s2888_s2 + $0x128] sm:$0xff]  ;;  %v1387_v30 = vld [vmem:[%s2888_s2 + $0x130] sm:$0xff]  ;;  %v1389_v33 = vld [vmem:[%s2888_s2 + $0x140] sm:$0xff]  ;;  %1797 = vmatprep.mubr.msk.f32.mxu0 %vm2278_vm1, %v2279_v62 }
  0x13   :  { %1994 = vmatprep.subr.bf16.mxu1 %v1993_v22  ;;  %v2065_v27 = vpack.c.bf16 %v1386_v24, %v1385_v23  ;;  %v1391_v36 = vld [vmem:[%s2888_s2 + $0x150] sm:$0xff]  ;;  %v1393_v39 = vld [vmem:[%s2888_s2 + $0x160] sm:$0xff]  ;;  %v584_v51 = vld [vmem:[%s2889_s4 + $0x48] sm:$0xff] }
  0x14   :  { %v1395_v42 = vld [vmem:[%s2888_s2 + $0x170] sm:$0xff]  ;;  %v579_v45 = vld [vmem:[%s2889_s4 + $0x20] sm:$0xff]  ;;  %v586_v54 = vld [vmem:[%s2889_s4 + $0x58] sm:$0xff] }
  0x15   :  { %v581_v48 = vld [vmem:[%s2889_s4 + $0x30] sm:$0xff]  ;;  %v583_v50 = vld [vmem:[%s2889_s4 + $0x40] sm:$0xff]  ;;  %v588_v57 = vld [vmem:[%s2889_s4 + $0x68] sm:$0xff] }
  0x16   :  { %1996 = vmatpush3.bf16.msra.mxu1 %v1993_v22  ;;  %v585_v53 = vld [vmem:[%s2889_s4 + $0x50] sm:$0xff]  ;;  %v587_v56 = vld [vmem:[%s2889_s4 + $0x60] sm:$0xff]  ;;  %v590_v60 = vld [vmem:[%s2889_s4 + $0x78] sm:$0xff] }
  0x17   :  { %1998 = vmatprep.subr.bf16.mxu1 %v1997_v25  ;;  %v589_v59 = vld [vmem:[%s2889_s4 + $0x70] sm:$0xff] }
  0x1a   :  { %2000 = vmatpush3.bf16.msra.mxu1 %v1997_v25 }
  0x1b   :  { %2002 = vmatprep.subr.bf16.mxu1 %v2001_v28 }
  0x1e   :  { %2004 = vmatpush3.bf16.msra.mxu1 %v2001_v28 }
  0x1f   :  { %2006 = vmatprep.subr.bf16.mxu1 %v2005_v31 }
  0x22   :  { %2008 = vmatpush3.bf16.msra.mxu1 %v2005_v31  ;;  %v1388_v31 = vld [vmem:[%s2888_s2 + $0x138] sm:$0xff] }
  0x23   :  { %2010 = vmatprep.subr.bf16.mxu1 %v2009_v34  ;;  %v2069_v32 = vpack.c.bf16 %v1388_v31, %v1387_v30 }
  0x26   :  { %2012 = vmatpush3.bf16.msra.mxu1 %v2009_v34  ;;  %v1390_v34 = vld [vmem:[%s2888_s2 + $0x148] sm:$0xff] }
  0x27   :  { %2014 = vmatprep.subr.bf16.mxu1 %v2013_v37  ;;  %v2073_v35 = vpack.c.bf16 %v1390_v34, %v1389_v33 }
  0x2a   :  { %2016 = vmatpush3.bf16.msra.mxu1 %v2013_v37  ;;  %v1392_v37 = vld [vmem:[%s2888_s2 + $0x158] sm:$0xff] }
  0x2b   :  { %2018 = vmatprep.subr.bf16.mxu1 %v2017_v40  ;;  %v2077_v38 = vpack.c.bf16 %v1392_v37, %v1391_v36 }
  0x2d   :  { %1670 = vmatmul.mubr.f32.vlgmr.msra.gmra.mrb[4].mxu1 %v2337_v1  ;;  %v2277_v1 = vmov 0.0|0.0  }
  0x2e   :  { %2020 = vmatpush3.bf16.msra.mxu1 %v2017_v40  ;;  %1672 = vmatprep.mubr.f32.mxu1 %v2342_v2  ;;  %v575_v2 = vld [vmem:[%s2889_s4] sm:$0xff]  ;;  %v1394_v40 = vld [vmem:[%s2888_s2 + $0x168] sm:$0xff] }
  0x2f   :  { %2022 = vmatprep.subr.bf16.mxu1 %v2021_v43  ;;  %2089 = vmatprep.subr.bf16.mxu0 %v2277_v1  ;;  %v2523_v6 = vpack.c.bf16 %v576_v3, %v575_v2  ;;  %v2081_v41 = vpack.c.bf16 %v1394_v40, %v1393_v39 }
  0x31   :  { %1673 = vmatmul.mubr.f32.gmra.mrb[6].mxu1 %v2348_v4  ;;  %v577_v4 = vld [vmem:[%s2889_s4 + $0x10] sm:$0xff]  ;;  %2091 = vmatpush3.bf16.msra.mxu0 %v2523_v6 }
  0x32   :  { %2024 = vmatpush3.bf16.msra.mxu1 %v2021_v43  ;;  %v2529_v9 = vpack.c.bf16 %v578_v8, %v577_v4  ;;  %2092 = vmatprep.subr.bf16.mxu0 %v2277_v1  ;;  %v1396_v43 = vld [vmem:[%s2888_s2 + $0x178] sm:$0xff] }
  0x33   :  { %2026 = vmatprep.subr.bf16.mxu1 %v2025_v46  ;;  %v2085_v44 = vpack.c.bf16 %v1396_v43, %v1395_v42  ;;  %v2280_v43 = vmov 1966171168  }
  0x35   :  { %2094 = vmatpush3.bf16.msra.mxu0 %v2529_v9 }
  0x36   :  { %2028 = vmatpush3.bf16.msra.mxu1 %v2025_v46  ;;  %2095 = vmatprep.subr.bf16.mxu0 %v2277_v1  ;;  %v580_v46 = vld [vmem:[%s2889_s4 + $0x28] sm:$0xff] }
  0x37   :  { %2030 = vmatprep.subr.bf16.mxu1 %v2029_v49  ;;  %v2584_v47 = vpack.c.bf16 %v580_v46, %v579_v45  ;;  %v672_v45 = vlaneseq }
  0x39   :  { %2097 = vmatpush3.bf16.msra.mxu0 %v2584_v47 }
  0x3a   :  { %2032 = vmatpush3.bf16.msra.mxu1 %v2029_v49  ;;  %2098 = vmatprep.subr.bf16.mxu0 %v2277_v1 }
  0x3b   :  { %2034 = vmatprep.subr.bf16.mxu1 %v2033_v52 }
  0x3e   :  { %2036 = vmatpush3.bf16.msra.mxu1 %v2033_v52  ;;  %v2604_v52 = vpack.c.bf16 %v584_v51, %v583_v50 }
  0x3f   :  { %2038 = vmatprep.subr.bf16.mxu1 %v2037_v55 }
  0x42   :  { %2040 = vmatpush3.bf16.msra.mxu1 %v2037_v55  ;;  %v2614_v55 = vpack.c.bf16 %v586_v54, %v585_v53 }
  0x43   :  { %2042 = vmatprep.subr.bf16.mxu1 %v2041_v58 }
  0x46   :  { %2044 = vmatpush3.bf16.msra.mxu1 %v2041_v58  ;;  %v2624_v58 = vpack.c.bf16 %v588_v57, %v587_v56 }
  0x47   :  { %2046 = vmatprep.subr.bf16.mxu1 %v2045_v61 }
  0x4a   :  { %2048 = vmatpush3.bf16.msra.mxu1 %v2045_v61  ;;  %v2634_v61 = vpack.c.bf16 %v590_v60, %v589_v59  ;;  %v550_v59 = vld [vmem:[%s2891_s6] sm:$0x1] }
  0x4b   :  { %2058 = vmatprep.subr.bf16.mxu1 %v2057_v0 }
  0xdf   :  { %v1633_v12 = vpop.f32.mrb[0].mxu1  ;;  %v1723_v17 = vpop.f32.mrb[0].mxu0 }
  0xe0   :  { %v119_v18 = vpop.f32.mrb[1].mxu1  ;;  %v424_v22 = vpop.f32.mrb[1].mxu0 }
  0xe1   :  { %1707 = vmatprep.mubr.f32.mxu1 %v119_v18 }
  0xe2   :  { %1708 = vmatmul.mubr.f32.vlgmr.msra.gmra.mrb[4].mxu1 %v1633_v12 }
  0xe3   :  { %2060 = vmatpush3.bf16.msra.mxu1 %v2057_v0  ;;  %v1636_v25 = vpop.f32.mrb[2].mxu1  ;;  %v1726_v26 = vpop.f32.mrb[2].mxu0 }
  0xe4   :  { %2062 = vmatprep.subr.bf16.mxu1 %v2061_v19  ;;  %v129_v28 = vpop.f32.mrb[3].mxu1  ;;  %v434_v29 = vpop.f32.mrb[3].mxu0 }
  0xe5   :  { %1710 = vmatprep.mubr.f32.mxu1 %v129_v28 }
  0xe6   :  { %1711 = vmatmul.mubr.f32.gmra.mrb[6].mxu1 %v1636_v25 }
  0xe7   :  { %2064 = vmatpush3.bf16.msra.mxu1 %v2061_v19  ;;  %1759 = vmatprep.mubr.f32.mxu1 %v424_v22 }
  0xe8   :  { %2066 = vmatprep.subr.bf16.mxu1 %v2065_v27 }
  0xeb   :  { %2068 = vmatpush3.bf16.msra.mxu1 %v2065_v27 }
  0xec   :  { %2070 = vmatprep.subr.bf16.mxu1 %v2069_v32 }
  0xef   :  { %2072 = vmatpush3.bf16.msra.mxu1 %v2069_v32 }
  0xf0   :  { %2074 = vmatprep.subr.bf16.mxu1 %v2073_v35 }
  0xf3   :  { %2076 = vmatpush3.bf16.msra.mxu1 %v2073_v35 }
  0xf4   :  { %2078 = vmatprep.subr.bf16.mxu1 %v2077_v38 }
  0xf7   :  { %2080 = vmatpush3.bf16.msra.mxu1 %v2077_v38 }
  0xf8   :  { %2082 = vmatprep.subr.bf16.mxu1 %v2081_v41 }
  0xfb   :  { %2084 = vmatpush3.bf16.msra.mxu1 %v2081_v41 }
  0xfc   :  { %2086 = vmatprep.subr.bf16.mxu1 %v2085_v44 }
  0xff   :  { %2088 = vmatpush3.bf16.msra.mxu1 %v2085_v44  ;;  %v670_v44 = vunpack.c.l.s4 %v2280_v43  ;;  %v800_v43 = vld [vmem:[%s2892_s3 + $0x18] sm:$0xff] }
 0x101   :  { %v671_v46 = vunpack.c.0.s8 %v670_v44  ;;  %v801_v44 = vld [vmem:[%s2892_s3 + $0x20] sm:$0xff] }
 0x102   :  { %1760 = vmatmul.mubr.f32.vlgmr.msra.gmra.mrb[4].mxu1 %v1723_v17 }
 0x103   :  { %1762 = vmatprep.mubr.f32.mxu1 %v434_v29 }
 0x106   :  { %1763 = vmatmul.mubr.f32.gmra.mrb[6].mxu1 %v1726_v26 }
 0x107   :  { %1898 = vmatprep.mubr.msk.f32.mxu1 %vm40_vm0, %v2362_v7  ;;  %v582_v7 = vld [vmem:[%s2889_s4 + $0x38] sm:$0xff] }
 0x108   :  { %v2594_v49 = vpack.c.bf16 %v582_v7, %v581_v48  ;;  %v673_v48 = vshrl.u32 %v672_v45, 7  ;;  %v802_v45 = vld [vmem:[%s2892_s3 + $0x28] sm:$0xff] }
 0x10a   :  { %2100 = vmatpush3.bf16.msra.mxu0 %v2594_v49  ;;  %v2642_v7 = vsub.s32 %v671_v46, %v673_v48  ;;  %v2649_v56 = vsub.s32 0, %v673_v48  ;;  %v804_v46 = vld [vmem:[%s2892_s3 + $0x38] sm:$0xff]  ;;  %v805_v48 = vld [vmem:[%s2892_s3 + $0x40] sm:$0xff] }
 0x10b   :  { %2101 = vmatprep.subr.bf16.mxu0 %v2277_v1 }
 0x10e   :  { %2103 = vmatpush3.bf16.msra.mxu0 %v2604_v52 }
 0x10f   :  { %2104 = vmatprep.subr.bf16.mxu0 %v2277_v1 }
 0x112   :  { %2106 = vmatpush3.bf16.msra.mxu0 %v2614_v55 }
 0x113   :  { %2107 = vmatprep.subr.bf16.mxu0 %v2277_v1 }
 0x116   :  { %2109 = vmatpush3.bf16.msra.mxu0 %v2624_v58 }
 0x117   :  { %2110 = vmatprep.subr.bf16.mxu0 %v2277_v1 }
 0x11a   :  { %2112 = vmatpush3.bf16.msra.mxu0 %v2634_v61 }
 0x1d5   :  { %v1761_v63 = vpop.f32.mrb[4].mxu1 }
 0x1d6   :  { %v561_v0 = vmul.f32 %v1761_v63, %v1761_v63  ;;  %v526_v2 = vpop.f32.mrb[5].mxu1 }
 0x1d7   :  { %v551_v3 = vadd.f32 %v1761_v63, %v526_v2  ;;  %v560_v4 = vmul.f32 %v526_v2, %v526_v2 }
 0x1d9   :  { %v564_v8 = vadd.f32 %v561_v0, %v560_v4  ;;  %v1764_v10 = vpop.f32.mrb[6].mxu1 }
 0x1da   :  { %v536_v11 = vpop.f32.mrb[7].mxu1  ;;  %v563_v18 = vmul.f32 %v1764_v10, %v1764_v10 }
 0x1db   :  { %v552_v12 = vadd.f32 %v551_v3, %v536_v11  ;;  %v562_v17 = vmul.f32 %v536_v11, %v536_v11 }
 0x1dd   :  { %v553_v19 = vadd.f32 %v1764_v10, %v552_v12  ;;  %v565_v22 = vadd.f32 %v564_v8, %v562_v17 }
 0x1df   :  { %v554_v23 = vrot.slane %v553_v19, 4  ;;  %v566_v24 = vadd.f32 %v565_v22, %v563_v18 }
 0x1e1   :  { %v555_v25 = vadd.f32 %v554_v23, %v553_v19  ;;  %v567_v26 = vrot.slane %v566_v24, 4 }
 0x1e3   :  { %v556_v27 = vrot.slane %v555_v25, 2  ;;  %v568_v28 = vadd.f32 %v567_v26, %v566_v24 }
 0x1e5   :  { %v557_v29 = vadd.f32 %v556_v27, %v555_v25  ;;  %v569_v30 = vrot.slane %v568_v28, 2 }
 0x1e7   :  { %v558_v31 = vrot.slane %v557_v29, 1  ;;  %v570_v32 = vadd.f32 %v569_v30, %v568_v28  ;;  %v1403_v30 = vld [vmem:[%s2892_s3 + $0x90] sm:$0xff] }
 0x1e9   :  { %v571_v33 = vrot.slane %v570_v32, 1  ;;  %v559_v34 = vadd.f32 %v558_v31, %v557_v29  ;;  %v1404_v31 = vld [vmem:[%s2892_s3 + $0x98] sm:$0xff] }
 0x1eb   :  { %v572_v35 = vadd.f32 %v571_v33, %v570_v32  ;;  %v2125_v32 = vpack.c.bf16 %v1404_v31, %v1403_v30  ;;  %v1405_v33 = vld [vmem:[%s2892_s3 + $0xa0] sm:$0xff]  ;;  %v1427_v30 = vld [vmem:[%s2892_s3 + $0x130] sm:$0xff]  ;;  %v1428_v31 = vld [vmem:[%s2892_s3 + $0x138] sm:$0xff] }
 0x1ed   :  { %v574_v36 = vsel %vm573_vm2, %v559_v34, %v572_v35  ;;  %v1406_v34 = vld [vmem:[%s2892_s3 + $0xa8] sm:$0xff] }
 0x1ee   :  { %1798 = vmatmul.mubr.f32.vlgmr.msra.gmra.mrb[4].mxu0 %v574_v36  ;;  %v2129_v35 = vpack.c.bf16 %v1406_v34, %v1405_v33  ;;  %v1407_v36 = vld [vmem:[%s2892_s3 + $0xb0] sm:$0xff]  ;;  %v1429_v33 = vld [vmem:[%s2892_s3 + $0x140] sm:$0xff]  ;;  %v1430_v34 = vld [vmem:[%s2892_s3 + $0x148] sm:$0xff] }
 0x1ef   :  { %1808 = vmatprep.mubr.msk.f32.mxu0 %vm40_vm0, %v2353_v5  ;;  %v549_v5 = vld [vmem:[%s2890_s5] sm:$0x1] }
 0x2c1   :  { %v657_v37 = vpop.f32.mrb[4].mxu0 }
 0x2c2   :  { %v661_v38 = vmul.f32 %v657_v37, %v657_v37  ;;  %v1799_v39 = vpop.f32.mrb[5].mxu0 }
 0x2c3   :  { %v1416_v39 = vld [vmem:[%s2892_s3 + $0xf8] sm:$0xff] }
 0x2c4   :  { %v663_v40 = vrot.slane %v661_v38, 7  ;;  %v1415_v38 = vld [vmem:[%s2892_s3 + $0xf0] sm:$0xff] }
 0x2c6   :  { %v665_v41 = vsub.f32 %v657_v37, %v663_v40  ;;  %v797_v40 = vld [vmem:[%s2892_s3] sm:$0xff] }
 0x2c8   :  { %v666_v42 = vadd.f32 1e-05, %v665_v41  ;;  %v798_v41 = vld [vmem:[%s2892_s3 + $0x8] sm:$0xff] }
 0x2ca   :  { %2269 = vrsqrt.f32 %v666_v42  ;;  %v799_v42 = vld [vmem:[%s2892_s3 + $0x10] sm:$0xff] }
 0x2d4   :  { %v2270_v50 = vpop.eup %2269 }
 0x2d5   :  { %v675_v51 = vrot.slane %v2270_v50, %v2642_v7  ;;  %v806_v50 = vld [vmem:[%s2892_s3 + $0x48] sm:$0xff] }
 0x2d7   :  { %v676_v53 = vcombine.high %v675_v51, %v675_v51  ;;  %v2169_v51 = vpack.c.bf16 %v806_v50, %v805_v48 }
 0x2d9   :  { %v683_v54 = vrot.slane %v676_v53, %v2642_v7  ;;  %v807_v53 = vld [vmem:[%s2892_s3 + $0x50] sm:$0xff] }
 0x2db   :  { %v685_v57 = vmul.f32 %v683_v54, %v549_v5  ;;  %v808_v5 = vld [vmem:[%s2892_s3 + $0x58] sm:$0xff] }
 0x2dc   :  { %v2173_v54 = vpack.c.bf16 %v808_v5, %v807_v53 }
 0x2dd   :  { %v686_v60 = vmul.f32 %v685_v57, %v657_v37  ;;  %v692_v0 = vrot.slane %v685_v57, %v2649_v56  ;;  %v1414_v37 = vld [vmem:[%s2892_s3 + $0xe8] sm:$0xff]  ;;  %v809_v57 = vld [vmem:[%s2892_s3 + $0x60] sm:$0xff] }
 0x2df   :  { %v687_v3 = vsub.f32 %v550_v59, %v686_v60  ;;  %v694_v4 = vmul.f32 %v692_v0, %v526_v2  ;;  %v695_v8 = vmul.f32 %v1761_v63, %v692_v0  ;;  %v696_v12 = vmul.f32 %v692_v0, %v536_v11  ;;  %v1402_v11 = vld [vmem:[%s2892_s3 + $0x88] sm:$0xff] }
 0x2e0   :  { %v697_v17 = vmul.f32 %v1764_v10, %v692_v0  ;;  %v1401_v10 = vld [vmem:[%s2892_s3 + $0x80] sm:$0xff]  ;;  %v810_v59 = vld [vmem:[%s2892_s3 + $0x68] sm:$0xff]  ;;  %v811_v0 = vld [vmem:[%s2892_s3 + $0x70] sm:$0xff] }
 0x2e1   :  { %v702_v18 = vrot.slane %v687_v3, %v2649_v56  ;;  %v2121_v29 = vpack.c.bf16 %v1402_v11, %v1401_v10  ;;  %v2177_v60 = vpack.c.bf16 %v810_v59, %v809_v57  ;;  %v812_v3 = vld [vmem:[%s2892_s3 + $0x78] sm:$0xff] }
 0x2e3   :  { %v704_v19 = vadd.f32 %v702_v18, %v694_v4  ;;  %v2656_v22 = vadd.f32 %v702_v18, %v695_v8  ;;  %v2658_v23 = vadd.f32 %v702_v18, %v696_v12  ;;  %v2660_v24 = vadd.f32 %v702_v18, %v697_v17  ;;  %v1421_v8 = vld [vmem:[%s2892_s3 + $0x100] sm:$0xff]  ;;  %v1422_v12 = vld [vmem:[%s2892_s3 + $0x108] sm:$0xff]  ;;  %v1423_v18 = vld [vmem:[%s2892_s3 + $0x110] sm:$0xff] }
 0x2e4   :  { %v2181_v4 = vpack.c.bf16 %v812_v3, %v811_v0  ;;  %v2193_v17 = vpack.c.bf16 %v1422_v12, %v1421_v8 }
 0x2e5   :  { %v708_v25 = vmax.f32 %v704_v19, 0.0  ;;  %v709_v26 = vmax.f32 %v2656_v22, 0.0  ;;  %v710_v27 = vmax.f32 %v2658_v23, 0.0  ;;  %v711_v28 = vmax.f32 %v2660_v24, 0.0  ;;  %v1424_v19 = vld [vmem:[%s2892_s3 + $0x118] sm:$0xff] }
 0x2e7   :  { %v2113_v63 = vpack.c.bf16 %v709_v26, %v708_v25  ;;  %v2117_v2 = vpack.c.bf16 %v711_v28, %v710_v27 }
 0x2e9   :  { %2114 = vmatprep.subr.bf16.mxu0 %v2113_v63  ;;  %2186 = vmatprep.subr.bf16.mxu1 %v2113_v63 }
 0x2ea   :  { %2116 = vmatpush3.bf16.msra.mxu0 %v2113_v63  ;;  %2188 = vmatpush3.bf16.msra.mxu1 %v2113_v63 }
 0x2eb   :  { %2118 = vmatprep.subr.bf16.mxu0 %v2117_v2  ;;  %2190 = vmatprep.subr.bf16.mxu1 %v2117_v2 }
 0x2ee   :  { %2120 = vmatpush3.bf16.msra.mxu0 %v2117_v2  ;;  %2192 = vmatpush3.bf16.msra.mxu1 %v2117_v2 }
 0x2ef   :  { %2122 = vmatprep.subr.bf16.mxu0 %v2121_v29  ;;  %2225 = vmatprep.subr.bf16.mxu1 %v2277_v1 }
 0x2f1   :  { %1809 = vmatmul.mubr.msk.f32.vlgmr.msra.gmra.mrb[6].mxu0 %vm40_vm0, %v2381_v13  ;;  %1899 = vmatmul.mubr.msk.f32.vlgmr.msra.gmra.mrb[8].mxu1 %vm40_vm0, %v2386_v14  ;;  %v1408_v13 = vld [vmem:[%s2892_s3 + $0xb8] sm:$0xff] }
 0x2f2   :  { %2124 = vmatpush3.bf16.msra.mxu0 %v2121_v29  ;;  %1811 = vmatprep.mubr.msk.f32.mxu0 %vm40_vm0, %v2391_v15  ;;  %v2133_v14 = vpack.c.bf16 %v1408_v13, %v1407_v36  ;;  %v1409_v15 = vld [vmem:[%s2892_s3 + $0xc0] sm:$0xff]  ;;  %v1431_v36 = vld [vmem:[%s2892_s3 + $0x150] sm:$0xff]  ;;  %v1432_v13 = vld [vmem:[%s2892_s3 + $0x158] sm:$0xff] }
 0x2f3   :  { %2126 = vmatprep.subr.bf16.mxu0 %v2125_v32  ;;  %1901 = vmatprep.mubr.msk.f32.mxu1 %vm40_vm0, %v2396_v16  ;;  %v1410_v16 = vld [vmem:[%s2892_s3 + $0xc8] sm:$0xff] }
 0x2f4   :  { %2227 = vmatpush3.bf16.msra.mxu1 %v2523_v6  ;;  %v1412_v6 = vld [vmem:[%s2892_s3 + $0xd8] sm:$0xff] }
 0x2f5   :  { %1812 = vmatmul.mubr.msk.f32.gmra.mrb[8].mxu0 %vm40_vm0, %v2413_v20  ;;  %1902 = vmatmul.mubr.msk.f32.gmra.mrb[10].mxu1 %vm40_vm0, %v2420_v21  ;;  %v2137_v20 = vpack.c.bf16 %v1410_v16, %v1409_v15  ;;  %v1411_v21 = vld [vmem:[%s2892_s3 + $0xd0] sm:$0xff]  ;;  %v1433_v15 = vld [vmem:[%s2892_s3 + $0x160] sm:$0xff]  ;;  %v1434_v16 = vld [vmem:[%s2892_s3 + $0x168] sm:$0xff] }
 0x2f6   :  { %2128 = vmatpush3.bf16.msra.mxu0 %v2125_v32  ;;  %1846 = vmatprep.mubr.f32.mxu0 %v708_v25  ;;  %v2197_v25 = vpack.c.bf16 %v1424_v19, %v1423_v18  ;;  %v2205_v32 = vpack.c.bf16 %v1428_v31, %v1427_v30 }
 0x2f7   :  { %2130 = vmatprep.subr.bf16.mxu0 %v2129_v35  ;;  %2228 = vmatprep.subr.bf16.mxu1 %v2277_v1 }
 0x2f8   :  { %2230 = vmatpush3.bf16.msra.mxu1 %v2529_v9  ;;  %1974 = vmatprep.mubr.msk.f32.mxu1 %vm2278_vm1, %v2279_v62  ;;  %v2141_v9 = vpack.c.bf16 %v1412_v6, %v1411_v21  ;;  %v1413_v62 = vld [vmem:[%s2892_s3 + $0xe0] sm:$0xff]  ;;  %v1435_v21 = vld [vmem:[%s2892_s3 + $0x170] sm:$0xff]  ;;  %v1436_v6 = vld [vmem:[%s2892_s3 + $0x178] sm:$0xff] }
 0x2f9   :  { %2231 = vmatprep.subr.bf16.mxu1 %v2277_v1 }
 0x2fa   :  { %2132 = vmatpush3.bf16.msra.mxu0 %v2129_v35  ;;  %v2209_v35 = vpack.c.bf16 %v1430_v34, %v1429_v33 }
 0x2fb   :  { %2134 = vmatprep.subr.bf16.mxu0 %v2133_v14 }
 0x2fc   :  { %2233 = vmatpush3.bf16.msra.mxu1 %v2584_v47  ;;  %v2145_v47 = vpack.c.bf16 %v1414_v37, %v1413_v62 }
 0x2fd   :  { %2234 = vmatprep.subr.bf16.mxu1 %v2277_v1 }
 0x2fe   :  { %2136 = vmatpush3.bf16.msra.mxu0 %v2133_v14  ;;  %v2213_v14 = vpack.c.bf16 %v1432_v13, %v1431_v36 }
 0x2ff   :  { %2138 = vmatprep.subr.bf16.mxu0 %v2137_v20 }
 0x300   :  { %2236 = vmatpush3.bf16.msra.mxu1 %v2594_v49  ;;  %v2149_v49 = vpack.c.bf16 %v1416_v39, %v1415_v38 }
 0x301   :  { %2237 = vmatprep.subr.bf16.mxu1 %v2277_v1 }
 0x302   :  { %2140 = vmatpush3.bf16.msra.mxu0 %v2137_v20  ;;  %v2217_v20 = vpack.c.bf16 %v1434_v16, %v1433_v15  ;;  %v2274_v16 = vld [vmem:[%s2886_s0 + $0x8] sm:$0xff] }
 0x303   :  { %2142 = vmatprep.subr.bf16.mxu0 %v2141_v9 }
 0x304   :  { %2239 = vmatpush3.bf16.msra.mxu1 %v2604_v52  ;;  %v2153_v52 = vpack.c.bf16 %v798_v41, %v797_v40 }
 0x305   :  { %2240 = vmatprep.subr.bf16.mxu1 %v2277_v1 }
 0x306   :  { %2144 = vmatpush3.bf16.msra.mxu0 %v2141_v9  ;;  %v2221_v9 = vpack.c.bf16 %v1436_v6, %v1435_v21  ;;  %v2276_v6 = vld [vmem:[%s2886_s0 + $0x18] sm:$0xff] }
 0x307   :  { %2146 = vmatprep.subr.bf16.mxu0 %v2145_v47 }
 0x308   :  { %2242 = vmatpush3.bf16.msra.mxu1 %v2614_v55  ;;  %v2157_v55 = vpack.c.bf16 %v800_v43, %v799_v42 }
 0x309   :  { %2243 = vmatprep.subr.bf16.mxu1 %v2277_v1 }
 0x30a   :  { %2148 = vmatpush3.bf16.msra.mxu0 %v2145_v47 }
 0x30b   :  { %2150 = vmatprep.subr.bf16.mxu0 %v2149_v49 }
 0x30c   :  { %2245 = vmatpush3.bf16.msra.mxu1 %v2624_v58  ;;  %v803_v58 = vld [vmem:[%s2892_s3 + $0x30] sm:$0xff] }
 0x30d   :  { %2246 = vmatprep.subr.bf16.mxu1 %v2277_v1  ;;  %v2161_v1 = vpack.c.bf16 %v802_v45, %v801_v44 }
 0x30e   :  { %2152 = vmatpush3.bf16.msra.mxu0 %v2149_v49 }
 0x30f   :  { %2154 = vmatprep.subr.bf16.mxu0 %v2153_v52 }
 0x310   :  { %2248 = vmatpush3.bf16.msra.mxu1 %v2634_v61  ;;  %v2165_v61 = vpack.c.bf16 %v804_v46, %v803_v58 }
 0x311   :  { %1847 = vmatmul.mubr.f32.vlgmr.msra.gmra.mrb[10].mxu0 %v709_v26 }
 0x312   :  { %1849 = vmatprep.mubr.f32.mxu0 %v710_v27  ;;  %2156 = vmatpush3.bf16.msra.mxu0 %v2153_v52  ;;  %v1425_v27 = vld [vmem:[%s2892_s3 + $0x120] sm:$0xff] }
 0x313   :  { %2158 = vmatprep.subr.bf16.mxu0 %v2157_v55 }
 0x315   :  { %1850 = vmatmul.mubr.f32.gmra.mrb[12].mxu0 %v711_v28  ;;  %v1426_v28 = vld [vmem:[%s2892_s3 + $0x128] sm:$0xff] }
 0x316   :  { %2160 = vmatpush3.bf16.msra.mxu0 %v2157_v55  ;;  %v2201_v10 = vpack.c.bf16 %v1426_v28, %v1425_v27 }
 0x317   :  { %2162 = vmatprep.subr.bf16.mxu0 %v2161_v1 }
 0x31a   :  { %2164 = vmatpush3.bf16.msra.mxu0 %v2161_v1 }
 0x31b   :  { %2166 = vmatprep.subr.bf16.mxu0 %v2165_v61 }
 0x31e   :  { %2168 = vmatpush3.bf16.msra.mxu0 %v2165_v61 }
 0x31f   :  { %2170 = vmatprep.subr.bf16.mxu0 %v2169_v51 }
 0x322   :  { %2172 = vmatpush3.bf16.msra.mxu0 %v2169_v51 }
 0x323   :  { %2174 = vmatprep.subr.bf16.mxu0 %v2173_v54 }
 0x326   :  { %2176 = vmatpush3.bf16.msra.mxu0 %v2173_v54 }
 0x327   :  { %2178 = vmatprep.subr.bf16.mxu0 %v2177_v60 }
 0x32a   :  { %2180 = vmatpush3.bf16.msra.mxu0 %v2177_v60 }
 0x32b   :  { %2182 = vmatprep.subr.bf16.mxu0 %v2181_v4 }
 0x32e   :  { %2184 = vmatpush3.bf16.msra.mxu0 %v2181_v4 }
 0x32f   :  { %2194 = vmatprep.subr.bf16.mxu0 %v2193_v17 }
 0x3c4   :  { %v1810_v22 = vpop.f32.mrb[6].mxu0  ;;  %v1900_v23 = vpop.f32.mrb[8].mxu1 }
 0x3c5   :  { %v778_v24 = vpop.f32.mrb[7].mxu0  ;;  %v1066_v26 = vpop.f32.mrb[9].mxu1 }
 0x3c6   :  { %1884 = vmatprep.mubr.f32.mxu0 %v778_v24 }
 0x3c7   :  { %1885 = vmatmul.mubr.f32.vlgmr.msra.gmra.mrb[10].mxu0 %v1810_v22 }
 0x3c8   :  { %2196 = vmatpush3.bf16.msra.mxu0 %v2193_v17  ;;  %v1813_v63 = vpop.f32.mrb[8].mxu0  ;;  %v1903_v2 = vpop.f32.mrb[10].mxu1 }
 0x3c9   :  { %2198 = vmatprep.subr.bf16.mxu0 %v2197_v25  ;;  %v788_v11 = vpop.f32.mrb[9].mxu0  ;;  %v1076_v29 = vpop.f32.mrb[11].mxu1 }
 0x3ca   :  { %1887 = vmatprep.mubr.f32.mxu0 %v788_v11 }
 0x3cb   :  { %1888 = vmatmul.mubr.f32.gmra.mrb[12].mxu0 %v1813_v63 }
 0x3cc   :  { %2200 = vmatpush3.bf16.msra.mxu0 %v2197_v25  ;;  %1936 = vmatprep.mubr.f32.mxu0 %v1066_v26  ;;  %v1192_v26 = vld [vmem:[%s2894_s8] sm:$0x1] }
 0x3cd   :  { %2202 = vmatprep.subr.bf16.mxu0 %v2201_v10 }
 0x3d0   :  { %2204 = vmatpush3.bf16.msra.mxu0 %v2201_v10 }
 0x3d1   :  { %2206 = vmatprep.subr.bf16.mxu0 %v2205_v32 }
 0x3d4   :  { %2208 = vmatpush3.bf16.msra.mxu0 %v2205_v32 }
 0x3d5   :  { %2210 = vmatprep.subr.bf16.mxu0 %v2209_v35 }
 0x3d8   :  { %2212 = vmatpush3.bf16.msra.mxu0 %v2209_v35 }
 0x3d9   :  { %2214 = vmatprep.subr.bf16.mxu0 %v2213_v14 }
 0x3dc   :  { %2216 = vmatpush3.bf16.msra.mxu0 %v2213_v14  ;;  %v2273_v14 = vld [vmem:[%s2886_s0] sm:$0xff] }
 0x3dd   :  { %2218 = vmatprep.subr.bf16.mxu0 %v2217_v20 }
 0x3e0   :  { %2220 = vmatpush3.bf16.msra.mxu0 %v2217_v20 }
 0x3e1   :  { %2222 = vmatprep.subr.bf16.mxu0 %v2221_v9 }
 0x3e4   :  { %2224 = vmatpush3.bf16.msra.mxu0 %v2221_v9 }
 0x3e7   :  { %1937 = vmatmul.mubr.f32.vlgmr.msra.gmra.mrb[10].mxu0 %v1900_v23  ;;  %v1191_v23 = vld [vmem:[%s2893_s7] sm:$0x1] }
 0x3e8   :  { %1939 = vmatprep.mubr.f32.mxu0 %v1076_v29 }
 0x3eb   :  { %1940 = vmatmul.mubr.f32.gmra.mrb[12].mxu0 %v1903_v2 }
 0x4ba   :  { %v1938_v62 = vpop.f32.mrb[10].mxu0 }
 0x4bb   :  { %v1203_v37 = vmul.f32 %v1938_v62, %v1938_v62  ;;  %v1168_v47 = vpop.f32.mrb[11].mxu0 }
 0x4bc   :  { %v1193_v38 = vadd.f32 %v1938_v62, %v1168_v47  ;;  %v1202_v39 = vmul.f32 %v1168_v47, %v1168_v47 }
 0x4be   :  { %v1206_v49 = vadd.f32 %v1203_v37, %v1202_v39  ;;  %v1941_v40 = vpop.f32.mrb[12].mxu0 }
 0x4bf   :  { %v1178_v41 = vpop.f32.mrb[13].mxu0  ;;  %v1205_v43 = vmul.f32 %v1941_v40, %v1941_v40 }
 0x4c0   :  { %v1194_v52 = vadd.f32 %v1193_v38, %v1178_v41  ;;  %v1204_v42 = vmul.f32 %v1178_v41, %v1178_v41 }
 0x4c2   :  { %v1195_v55 = vadd.f32 %v1941_v40, %v1194_v52  ;;  %v1207_v44 = vadd.f32 %v1206_v49, %v1204_v42 }
 0x4c4   :  { %v1196_v45 = vrot.slane %v1195_v55, 4  ;;  %v1208_v1 = vadd.f32 %v1207_v44, %v1205_v43 }
 0x4c6   :  { %v1197_v58 = vadd.f32 %v1196_v45, %v1195_v55  ;;  %v1209_v46 = vrot.slane %v1208_v1, 4 }
 0x4c8   :  { %v1198_v61 = vrot.slane %v1197_v58, 2  ;;  %v1210_v48 = vadd.f32 %v1209_v46, %v1208_v1 }
 0x4ca   :  { %v1199_v50 = vadd.f32 %v1198_v61, %v1197_v58  ;;  %v1211_v51 = vrot.slane %v1210_v48, 2 }
 0x4cc   :  { %v1200_v53 = vrot.slane %v1199_v50, 1  ;;  %v1212_v5 = vadd.f32 %v1211_v51, %v1210_v48 }
 0x4ce   :  { %v1213_v54 = vrot.slane %v1212_v5, 1  ;;  %v1201_v57 = vadd.f32 %v1200_v53, %v1199_v50 }
 0x4d0   :  { %v1214_v59 = vadd.f32 %v1213_v54, %v1212_v5 }
 0x4d2   :  { %v1215_v60 = vsel %vm573_vm2, %v1201_v57, %v1214_v59 }
 0x4d3   :  { %1975 = vmatmul.mubr.f32.vlgmr.msra.gmra.mrb[12].mxu1 %v1215_v60 }
 0x5a6   :  { %v1282_v0 = vpop.f32.mrb[12].mxu1 }
 0x5a7   :  { %v1286_v3 = vmul.f32 %v1282_v0, %v1282_v0  ;;  %v1976_v4 = vpop.f32.mrb[13].mxu1 }
 0x5a9   :  { %v1288_v8 = vrot.slane %v1286_v3, 7 }
 0x5ab   :  { %v1290_v12 = vsub.f32 %v1282_v0, %v1288_v8 }
 0x5ad   :  { %v1291_v17 = vadd.f32 1e-05, %v1290_v12 }
 0x5af   :  { %2271 = vrsqrt.f32 %v1291_v17 }
 0x5b9   :  { %v2272_v18 = vpop.eup %2271 }
 0x5ba   :  { %v1300_v19 = vrot.slane %v2272_v18, %v2642_v7 }
 0x5bc   :  { %v1301_v22 = vcombine.high %v1300_v19, %v1300_v19 }
 0x5be   :  { %v1308_v24 = vrot.slane %v1301_v22, %v2642_v7 }
 0x5c0   :  { %v1310_v25 = vmul.f32 %v1308_v24, %v1191_v23 }
 0x5c2   :  { %v1311_v27 = vmul.f32 %v1310_v25, %v1282_v0  ;;  %v1317_v28 = vrot.slane %v1310_v25, %v2649_v56 }
 0x5c4   :  { %v1312_v63 = vsub.f32 %v1192_v26, %v1311_v27  ;;  %v1319_v2 = vmul.f32 %v1317_v28, %v1168_v47  ;;  %v1320_v10 = vmul.f32 %v1938_v62, %v1317_v28  ;;  %v1321_v11 = vmul.f32 %v1317_v28, %v1178_v41 }
 0x5c5   :  { %v1322_v29 = vmul.f32 %v1941_v40, %v1317_v28 }
 0x5c6   :  { %v1327_v30 = vrot.slane %v1312_v63, %v2649_v56  ;;  %v2275_v56 = vld [vmem:[%s2886_s0 + $0x10] sm:$0xff] }
 0x5c8   :  { %v1329_v31 = vadd.f32 %v1327_v30, %v1319_v2  ;;  %v1330_v32 = vadd.f32 %v1327_v30, %v1320_v10  ;;  %v1331_v33 = vadd.f32 %v1327_v30, %v1321_v11  ;;  %v1332_v34 = vadd.f32 %v1327_v30, %v1322_v29 }
 0x5ca   :  { %v1333_v7 = vmax.f32 %v1329_v31, 0.0  ;;  %v1334_v35 = vmax.f32 %v1330_v32, 0.0  ;;  %v1335_v36 = vmax.f32 %v1331_v33, 0.0  ;;  %v1336_v13 = vmax.f32 %v1332_v34, 0.0 }
 0x5cc   :  { %v1337_v15 = vadd.f32 %v2273_v14, %v1333_v7  ;;  %v1338_v20 = vadd.f32 %v2274_v16, %v1334_v35  ;;  %v1339_v21 = vadd.f32 %v2275_v56, %v1335_v36  ;;  %v1340_v9 = vadd.f32 %v2276_v6, %v1336_v13 }
 0x5ce   :  { %v1341_v62 = vmax.f32 %v1337_v15, 0.0  ;;  %v1342_v37 = vmax.f32 %v1338_v20, 0.0  ;;  %v1343_v47 = vmax.f32 %v1339_v21, 0.0  ;;  %v1344_v38 = vmax.f32 %v1340_v9, 0.0 }
 0x5d0   :  { %1345 = vst [vmem:[%s2895_s9] sm:$0xff] %v1341_v62  ;;  %1346 = vst [vmem:[%s2895_s9 + $0x8] sm:$0xff] %v1342_v37 }
 0x5d1   :  { %1347 = vst [vmem:[%s2895_s9 + $0x10] sm:$0xff] %v1343_v47  ;;  %1348 = vst [vmem:[%s2895_s9 + $0x18] sm:$0xff] %v1344_v38 }

</bundles_post_ra>
